<compile_context>
chip_gen: v7x
topology: tpu7x:2x2x1
jax: 0.10.0
libtpu: 0.0.40
codegen_flags: <defaults>
</compile_context>

<pallas_src>
import jax
import jax.numpy as jnp
from jax.experimental import pallas as pl
from jax.experimental.pallas import tpu as pltpu


def _rotate_half(x):
    """[x1, x2] -> [x2, x1] along the last axis."""
    d = x.shape[-1]
    half = d // 2
    if d % 128 == 0:
        # Full-vreg lane rotation on the XLU (shift by half == swap halves).
        return pltpu.roll(x, shift=half, axis=x.ndim - 1)
    # Small head_dim fallback (not lane-dense anyway).
    return jnp.concatenate([x[..., half:], x[..., :half]], axis=-1)


def _rope_rows_kernel(pos_ref, freq_ref, x_ref, o_ref):
    # pos_ref:  (tr, 1)   int32   position id of each (token, head) row
    # freq_ref: (1, D)    float32 signed angular freqs [f, -f]
    # x_ref:    (tr, D)   input rows (head_dim last / lane axis)
    # o_ref:    (tr, D)   output rows, same dtype as x
    theta = pos_ref[...].astype(jnp.float32) * freq_ref[...]      # (tr, D)
    c = jnp.cos(theta)
    s = jnp.sin(theta)
    x = x_ref[...].astype(jnp.float32)
    o_ref[...] = (x * c + _rotate_half(x) * s).astype(o_ref.dtype)


def _rope_tokens_kernel(pos_ref, freq_ref, x_ref, o_ref):
    # pos_ref:  (tt, 1)      int32   position id per token
    # freq_ref: (1, D)       float32 signed angular freqs [f, -f]
    # x_ref:    (tt, H, D)   all heads of each token
    # o_ref:    (tt, H, D)   output, same dtype as x
    theta = pos_ref[...].astype(jnp.float32) * freq_ref[...]      # (tt, D)
    c = jnp.cos(theta)[:, None, :]                                 # (tt, 1, D)
    s = jnp.sin(theta)[:, None, :]
    x = x_ref[...].astype(jnp.float32)
    o_ref[...] = (x * c + _rotate_half(x) * s).astype(o_ref.dtype)


def _pick_tile(n, target, unit):
    """Largest divisor of n that is a multiple of `unit` and <= target,
    preferring to leave >= 4 grid steps; falls back to the full extent."""
    cap = min(target, n)
    if n >= 4 * unit:
        cap = min(cap, max(unit, (n // 4) // unit * unit))
    best = 0
    d = unit
    while d <= cap:
        if n % d == 0:
            best = d
        d += unit
    return best if best > 0 else n


def rotary_pallas(x, pos_ids, angular_freq):
    """Apply rotary embedding.

    x:            (B, T, H, D)   float32 / bfloat16
    pos_ids:      (B, T)         int32 position ids
    angular_freq: (D // 2,)      float32 (dim//4 freqs followed by dim//4 zeros)
    Returns (B, T, H, D) with the same dtype as x.
    """
    B, T, H, D = x.shape
    half = D // 2
    assert D % 4 == 0, "head_dim must be divisible by 4"
    assert angular_freq.shape == (half,)

    # cos is even / sin is odd, so the signed full-width frequency vector lets
    # the kernel operate on fully packed vregs with a single rotate-half.
    freq_signed = jnp.concatenate(
        [angular_freq, -angular_freq]).astype(jnp.float32)[None, :]   # (1, D)

    itemsize = jnp.dtype(x.dtype).itemsize
    target_rows = 4096 if itemsize < 4 else 2048

    R = B * T * H
    dedup_heads = H >= 8   # (tt, H, D) blocks are sublane-dense enough then

    if dedup_heads:
        # Grid over tokens: cos/sin computed once per token, broadcast over H.
        N = B * T
        tt = _pick_tile(N, max(8, target_rows // H), unit=8)
        x_in = x.reshape(N, H, D)
        pos_in = pos_ids.reshape(N, 1).astype(jnp.int32)
        kernel = _rope_tokens_kernel
        grid = (N // tt,)
        in_specs = [
            pl.BlockSpec((tt, 1), lambda i: (i, 0)),        # pos ids
            pl.BlockSpec((1, D), lambda i: (0, 0)),         # signed freqs
            pl.BlockSpec((tt, H, D), lambda i: (i, 0, 0)),  # x tokens
        ]
        out_specs = pl.BlockSpec((tt, H, D), lambda i: (i, 0, 0))
        out_shape = jax.ShapeDtypeStruct((N, H, D), x.dtype)
        n_pos = N
    else:
        # Flat (token, head) rows: sublane-dense layout for small H.
        unit = 16 if itemsize < 4 else 8
        tr = _pick_tile(R, target_rows, unit=unit)
        x_in = x.reshape(R, D)
        pos_in = jnp.repeat(pos_ids.reshape(-1).astype(jnp.int32), H)[:, None]
        kernel = _rope_rows_kernel
        grid = (R // tr,)
        in_specs = [
            pl.BlockSpec((tr, 1), lambda i: (i, 0)),        # pos ids
            pl.BlockSpec((1, D), lambda i: (0, 0)),         # signed freqs
            pl.BlockSpec((tr, D), lambda i: (i, 0)),        # x rows
        ]
        out_specs = pl.BlockSpec((tr, D), lambda i: (i, 0))
        out_shape = jax.ShapeDtypeStruct((R, D), x.dtype)
        n_pos = R

    cost = pl.CostEstimate(
        flops=int(3 * R * D + n_pos * D),
        transcendentals=int(2 * n_pos * D),
        bytes_accessed=int(2 * R * D * itemsize + n_pos * 4 + D * 4),
    )

    out = pl.pallas_call(
        kernel,
        out_shape=out_shape,
        grid_spec=pltpu.PrefetchScalarGridSpec(
            num_scalar_prefetch=0,
            grid=grid,
            in_specs=in_specs,
            out_specs=out_specs,
        ),
        compiler_params=pltpu.CompilerParams(
            dimension_semantics=("parallel",),       # megacore-friendly (v7x)
        ),
        cost_estimate=cost,
    )(pos_in, freq_signed, x_in)

    return out.reshape(B, T, H, D)


def make_angular_freq(dim):
    """Matches Rotary.__init__: (1/1024)**linspace(0,1,dim//4) ++ zeros(dim//4)."""
    quarter = dim // 4
    freqs = (1.0 / 1024.0) ** jnp.linspace(0.0, 1.0, num=quarter, dtype=jnp.float32)
    return jnp.concatenate([freqs, jnp.zeros((quarter,), jnp.float32)])


def rotary_ref(x, pos_ids, angular_freq, max_seq_len):
    """Pure-JAX reference mirroring the torch forward (via precomputed table)."""
    t = jnp.arange(max_seq_len, dtype=jnp.float32)
    theta = t[:, None] * angular_freq[None, :]
    cos_tab = jnp.cos(theta)
    sin_tab = jnp.sin(theta)
    cos = cos_tab[pos_ids][:, :, None, :]          # (B, T, 1, half)
    sin = sin_tab[pos_ids][:, :, None, :]
    xf = x.astype(jnp.float32)
    half = x.shape[-1] // 2
    x1, x2 = xf[..., :half], xf[..., half:]
    y1 = x1 * cos + x2 * sin
    y2 = -x1 * sin + x2 * cos
    return jnp.concatenate([y1, y2], axis=-1).astype(x.dtype)


if __name__ == "__main__":
    key = jax.random.PRNGKey(0)
    max_pos = 256   # small table only for the reference check (module default 65536)

    configs = [
        # (batch, seq, heads, head_dim, dtype)
        (2, 8, 4, 128, jnp.float32),     # flat-row path, pltpu.roll (D=128)
        (2, 16, 8, 128, jnp.bfloat16),   # per-token dedup path, pltpu.roll
        (1, 8, 4, 64, jnp.float32),      # flat-row path, small-D fallback
    ]

    for idx, (b, t, h, d, dt) in enumerate(configs):
        kx, kp, key = jax.random.split(key, 3)
        x = jax.random.normal(kx, (b, t, h, d), dtype=jnp.float32).astype(dt)
        pos_ids = jax.random.randint(kp, (b, t), 0, max_pos, dtype=jnp.int32)
        angular_freq = make_angular_freq(d)

        out = rotary_pallas(x, pos_ids, angular_freq)
        jax.block_until_ready(out)

        ref = rotary_ref(x, pos_ids, angular_freq, max_pos)
        assert out.shape == ref.shape and out.dtype == ref.dtype, (idx, out.shape, out.dtype)
        err = float(jnp.max(jnp.abs(out.astype(jnp.float32) - ref.astype(jnp.float32))))
        tol = 8e-2 if dt == jnp.bfloat16 else 1e-4
        assert err <= tol, (idx, err)

    print("KERNEL_OK")
</pallas_src>

<mosaic_0001>
module attributes {stable_mosaic.version = 11 : i64} {
  func.func @_rope_rows_kernel(%arg0: i32, %arg1: memref<16x1xi32, #tpu.memory_space<vmem>>, %arg2: memref<1x128xf32, #tpu.memory_space<vmem>>, %arg3: memref<16x128xf32, #tpu.memory_space<vmem>>, %arg4: memref<16x128xf32, #tpu.memory_space<vmem>>) attributes {dimension_semantics = [#tpu.dimension_semantics<parallel>], iteration_bounds = array<i64: 4>, scalar_prefetch = 0 : i64, scratch_operands = 0 : i64, tpu.core_type = #tpu.core_type<tc>, window_params = [{transform_indices = @transform_0, window_bounds = array<i64: 16, 1>}, {pipeline_mode = #tpu.pipeline_mode<synchronous>, transform_indices = @transform_1, window_bounds = array<i64: 1, 128>}, {transform_indices = @transform_2, window_bounds = array<i64: 16, 128>}, {transform_indices = @transform_3, window_bounds = array<i64: 16, 128>}]} {
    %c0 = arith.constant 0 : index
    %c0_0 = arith.constant 0 : index
    %0 = vector.load %arg1[%c0, %c0_0] : memref<16x1xi32, #tpu.memory_space<vmem>>, vector<16x1xi32>
    %1 = arith.sitofp %0 : vector<16x1xi32> to vector<16x1xf32>
    %c0_1 = arith.constant 0 : index
    %c0_2 = arith.constant 0 : index
    %2 = vector.load %arg2[%c0_1, %c0_2] : memref<1x128xf32, #tpu.memory_space<vmem>>, vector<1x128xf32>
    %3 = vector.broadcast %1 : vector<16x1xf32> to vector<16x128xf32>
    %4 = vector.broadcast %2 : vector<1x128xf32> to vector<16x128xf32>
    %5 = arith.mulf %3, %4 : vector<16x128xf32>
    %6 = math.cos %5 : vector<16x128xf32>
    %7 = math.sin %5 : vector<16x128xf32>
    %c0_3 = arith.constant 0 : index
    %c0_4 = arith.constant 0 : index
    %8 = vector.load %arg3[%c0_3, %c0_4] : memref<16x128xf32, #tpu.memory_space<vmem>>, vector<16x128xf32>
    %9 = arith.mulf %8, %6 : vector<16x128xf32>
    %c64_i32 = arith.constant 64 : i32
    %10 = tpu.dynamic_rotate %8 by %c64_i32 dim 1 : vector<16x128xf32>, i32 -> vector<16x128xf32>
    %11 = arith.mulf %10, %7 : vector<16x128xf32>
    %12 = arith.addf %9, %11 : vector<16x128xf32>
    %c0_5 = arith.constant 0 : index
    %c0_6 = arith.constant 0 : index
    %13 = vector.load %arg4[%c0_5, %c0_6] : memref<16x128xf32, #tpu.memory_space<vmem>>, vector<16x128xf32>
    tpu.vector_store %arg4[%c0_5, %c0_6], %12 {strides = array<i32>} : memref<16x128xf32, #tpu.memory_space<vmem>>, vector<16x128xf32>,
    return
  }
  func.func @transform_0(%arg0: i32) -> (i32, i32) {
    %c0_i32 = arith.constant 0 : i32
    %c0_i32_0 = arith.constant 0 : i32
    return %arg0, %c0_i32 : i32, i32
  }
  func.func @transform_1(%arg0: i32) -> (i32, i32) {
    %c0_i32 = arith.constant 0 : i32
    %c0_i32_0 = arith.constant 0 : i32
    %c0_i32_1 = arith.constant 0 : i32
    return %c0_i32, %c0_i32_0 : i32, i32
  }
  func.func @transform_2(%arg0: i32) -> (i32, i32) {
    %c0_i32 = arith.constant 0 : i32
    %c0_i32_0 = arith.constant 0 : i32
    return %arg0, %c0_i32 : i32, i32
  }
  func.func @transform_3(%arg0: i32) -> (i32, i32) {
    %c0_i32 = arith.constant 0 : i32
    %c0_i32_0 = arith.constant 0 : i32
    return %arg0, %c0_i32 : i32, i32
  }
}

</mosaic_0001>

<bundles_post_ra>
// kernel: tpu_custom_call.1
= control target key start
LH: loop header
LB: loop body
LE: loop exit
PB: predicated region body
PF: predicated region fallthrough
CT: control target
= control target key end

     0   :  { %8 = vsyncpa [#allocation3], 0  ;;  %s1106_s0 = inlined_call_operand.vmem [shape: s32[64,1], index: 0, kind: input, shape index: {}]   ;;  %s1107_s1 = inlined_call_operand.vmem [shape: f32[1,128], index: 1, kind: input, shape index: {}]   ;;  %s1108_s2 = inlined_call_operand.vmem [shape: f32[64,128], index: 2, kind: input, shape index: {}]   ;;  %s1109_s3 = inlined_call_operand.hbm [shape: f32[64,128], index: 3, kind: output, shape index: {}]  }
   0x1   :  { %10 = vsyncpa [#allocation3 + $0x1], 0  ;;  %s926_s12 = smov 0   ;;  %s928_s13 = smov 0  }
   0x2   :  { %s930_s14 = smov 0   ;;  %s932_s15 = smov 0  }
   0x3 LB: > { %s947_s16 = sadd.s32 4294967295, %s893_s15   ;;  %s733_s17 = sadd.s32 4294967294, %s893_s15   ;;  %s893_s15 = sphi %s932_s15, %s1115_s15   ;;  %s889_s14 = sphi %s930_s14, %s1114_s14   ;;  %s885_s13 = sphi %s928_s13, %s1113_s13   ;;  %s881_s12 = sphi %s926_s12, %s1112_s12  }
   0x4   : > { %s951_s18 = sadd.s32 1, %s893_s15   ;;  %s96_s19 = sadd.s32 1, %s889_s14 }
   0x5   : > { %s93_s20 = ssub.s32 %s893_s15, %s951_s18  ;;  %p106_p0 = scmp.ne.s32.totalorder %s889_s14, %s885_s13 }
   0x6   : > { %p94_p1 = scmp.eq.s32.totalorder %s93_s20, 0  ;;  %p107_p2 = scmp.eq.s32.totalorder %s947_s16, 3 }
   0x7   : > { %p112_p3 = scmp.ne.s32.totalorder %s885_s13, %s881_s12  ;;  %p113_p4 = scmp.eq.s32.totalorder %s733_s17, 3 }
   0x8   : > { %s962_s21 = scalar_select %p94_p1, %s889_s14, %s96_s19  }
   0x9   : > { %p964_p5 = por %p107_p2, %p106_p0  ;;  %p968_p6 = por %p113_p4, %p112_p3 }
   0xa   : > { %p736_p7 = scmp.ge.s32.totalorder %s893_s15, 1  ;;  %p152_p8 = scmp.lt.s32.totalorder %s893_s15, 5 }
   0xc   : > { %p153_p9 = pnand %p736_p7, %p152_p8 }
   0xd   : > { %s738_s24 = sshll.u32 (!%p153_p9), %s947_s16, 1  ;;  %v895_v0 = vmov (!%p153_p9), 0   ;;  %s896_s5 = smov (!%p153_p9), 64   ;;  %v742_v7 = vld [vmem:[%s1107_s1] ss:$0 sm:$0xff] (!%p153_p9) }
   0xe   : > { %156 = sbr.rel (%p153_p9) target bundleno = 266 (0x10a), region = 32  ;;  %822 = vset.pattern.permute.xlu0 (!%p153_p9), %v895_v0  ;;  %p182_p10 = scmp.lt.s32.totalorder (!%p153_p9), %s738_s24, 7  ;;  %v897_v28 = vmov (!%p153_p9), 683565275   ;;  %v898_v32 = vmov (!%p153_p9), 2475754826  }
   0xf   : > { %v899_v34 = vmov (!%p153_p9), 2131351028   ;;  %v900_v36 = vmov (!%p153_p9), 2102212464   ;;  %v901_v38 = vmov (!%p153_p9), 920167782  }
  0x10   : > { %v902_v45 = vmov (!%p153_p9), 1326507024   ;;  %s178_s8 = sand.u32 (!%p153_p9), 1, %s885_s13   ;;  %s764_s17 = sshll.u32 (!%p153_p9), %s947_s16, 8 }
  0x11   : > { %s737_s9 = sshll.u32 (!%p153_p9), %s178_s8, 4  ;;  %s903_s16 = smov (!%p153_p9), [#allocation2]  }
  0x12   : > { %s180_s10 = scalar_lea.vmem (!%p153_p9), [#allocation2], %s737_s9  ;;  %s835_s27 = sshll.u32 (!%p153_p9), %s903_s16, 4  ;;  %s836_s27 = int_to_ptr.vmem [resolvable:$false] %s835_s27 }
  0x13   : > { %s659_s11 = sshll.u32 (!%p153_p9), %s180_s10, 4  ;;  %s1056_s11 = int_to_ptr.vmem [resolvable:$true] %s659_s11 }
  0x14   : > { %s831_s26 = scalar_lea.vmem (!%p153_p9), %s1056_s11, 256  ;;  %p838_p0 = scmp.lt.s32.totalorder (!%p153_p9), %s1056_s11, %s836_s27 }
  0x15   : > { %s1117_s24 = smov (!%p182_p10, %s738_s24), 7  ;;  %p832_p11 = scmp.ne.s32.totalorder %s1056_s11, %s831_s26 }
  0x16   : > { %s739_s25 = sshll.u32 %s1117_s24, 3  ;;  %s1061_s24 = scalar_lea.hbm %s1109_s3, %s764_s17 }
  0x17   : > { %s185_s28 = scalar_lea.vmem %s1106_s0, %s739_s25  ;;  %s191_s4 = scalar_lea.vmem %s1108_s2, %s739_s25 }
  0x18   : > { %v194_v1 = vld [vmem:[%s185_s28] sm:$0xff]  ;;  %v195_v2 = vld [vmem:[%s185_s28 + $0x8] sm:$0xff]  ;;  %s1065_s25 = scalar_lea.sflag [#allocation3], %s178_s8  ;;  %p833_p12 = pnand %p832_p11, %p964_p5 }
  0x19   : > { %v981_v3 = vld [vmem:[%s191_s4] sm:$0xff]  ;;  %v196_v4 = vcvt.s32.f32 %v194_v1  ;;  %v984_v5 = vld [vmem:[%s191_s4 + $0x8] sm:$0xff]  ;;  %v197_v6 = vcvt.s32.f32 %v195_v2  ;;  %s837_s28 = scalar_lea.vmem %s836_s27, 512 }
  0x1a   : > { %635 = vrot.lane.b32.xlu1 %v981_v3, %s896_s5  ;;  %p834_p13 = pneg %p833_p12  ;;  %p839_p1 = scmp.lt.s32.totalorder %s837_s28, %s831_s26 }
  0x1b   : > { %201 = vperm.xlu0 %822, %v196_v4  }
  0x1c   : > { %p840_p2 = por %p839_p1, %p838_p0 }
  0x1e   : > { %637 = vrot.lane.b32.xlu1 %v984_v5, %s896_s5  ;;  %p841_p3 = pnand %p840_p2, %p834_p13 }
  0x1f   : > { %206 = vperm.xlu0 %822, %v197_v6  }
  0x9a   : > { %v202_v8 = vpop.permute.xlu0 %201 }
  0x9b   : > { %v990_v9 = vmul.f32 %v742_v7, %v202_v8 }
  0x9d   : > { %v217_v10 = vand.u32 2147483647, %v990_v9  ;;  %v220_v11 = vand.u32 2139095040, %v990_v9  ;;  %vm219_vm14 = vcmp.lt.s32.totalorder %v990_v9, 0 }
  0x9e   : > { %v207_v12 = vpop.permute.xlu0 %206 }
  0x9f   : > { %v221_v13 = vshrl.u32 %v220_v11, 23  ;;  %v994_v14 = vmul.f32 %v742_v7, %v207_v12  ;;  %v224_v15 = vand.u32 8388607, %v217_v10  ;;  %vm218_vm15 = vcmp.le.f32.partialorder %v217_v10, 0.7853982 }
  0xa1   : > { %v743_v16 = vadd.s32 4294967169, %v221_v13  ;;  %v323_v17 = vand.u32 2139095040, %v994_v14  ;;  %v225_v19 = vor.u32 8388608, %v224_v15  ;;  %v320_v21 = vand.u32 2147483647, %v994_v14 }
  0xa3   : > { %v227_v18 = vadd.s32 1, %v743_v16  ;;  %v324_v20 = vshrl.u32 %v323_v17, 23  ;;  %v1000_v26 = vshll.u32 %v225_v19, 8  ;;  %v327_v30 = vand.u32 8388607, %v320_v21 }
  0xa5   : > { %vm228_vm0 = vcmp.gt.s32.totalorder %v227_v18, 0  ;;  %v747_v23 = vadd.s32 4294967169, %v324_v20  ;;  %v328_v60 = vor.u32 8388608, %v327_v30 }
  0xa6   : > { %v229_v22 = vsel %vm228_vm0, %v227_v18, 0  ;;  %vm322_vm0 = vcmp.lt.s32.totalorder %v994_v14, 0 }
  0xa7   : > { %v230_v24 = vshrl.u32 %v229_v22, 5  ;;  %v231_v25 = vand.u32 31, %v229_v22  ;;  %v330_v31 = vadd.s32 1, %v747_v23  ;;  %v368_v13 = vshll.u32 %v328_v60, 8 }
  0xa9   : > { %v232_v27 = vsub.s32 32, %v231_v25  ;;  %v234_v29 = vshll.u32 %v897_v28, %v231_v25  ;;  %v237_v33 = vshll.u32 %v898_v32, %v231_v25  ;;  %v240_v35 = vshll.u32 %v899_v34, %v231_v25 }
  0xaa   : > { %v243_v37 = vshll.u32 %v900_v36, %v231_v25  ;;  %v246_v39 = vshll.u32 %v901_v38, %v231_v25  ;;  %vm249_vm1 = vcmp.lt.s32.totalorder %v230_v24, 1  ;;  %vm251_vm2 = vcmp.lt.s32.totalorder %v230_v24, 3 }
  0xab   : > { %v235_v40 = vshrl.u32 %v898_v32, %v232_v27  ;;  %v238_v41 = vshrl.u32 %v899_v34, %v232_v27  ;;  %v241_v42 = vshrl.u32 %v900_v36, %v232_v27  ;;  %v233_v43 = vshrl.u32 %v897_v28, %v232_v27 }
  0xac   : > { %v244_v44 = vshrl.u32 %v901_v38, %v232_v27  ;;  %v247_v46 = vshrl.u32 %v902_v45, %v232_v27  ;;  %vm331_vm3 = vcmp.gt.s32.totalorder %v330_v31, 0  ;;  %vm252_vm4 = vcmp.lt.s32.totalorder %v230_v24, 4 }
  0xad   : > { %v236_v47 = vor.u32 %v235_v40, %v234_v29  ;;  %v239_v48 = vor.u32 %v238_v41, %v237_v33  ;;  %v242_v49 = vor.u32 %v241_v42, %v240_v35  ;;  %v332_v52 = vsel %vm331_vm3, %v330_v31, 0 }
  0xae   : > { %v245_v50 = vor.u32 %v244_v44, %v243_v37  ;;  %v248_v51 = vor.u32 %v247_v46, %v246_v39  ;;  %vm250_vm5 = vcmp.lt.s32.totalorder %v230_v24, 2  ;;  %v334_v63 = vand.u32 31, %v332_v52 }
  0xaf   : > { %v253_v53 = vsel %vm249_vm1, %v233_v43, %v236_v47  ;;  %v254_v54 = vsel %vm252_vm4, %v242_v49, 2102212464  ;;  %v257_v55 = vsel %vm249_vm1, %v236_v47, %v239_v48  ;;  %v261_v56 = vsel %vm249_vm1, %v239_v48, %v242_v49 }
  0xb0   : > { %v255_v57 = vsel %vm251_vm2, %v239_v48, %v254_v54  ;;  %v258_v58 = vsel %vm252_vm4, %v245_v50, 920167782  ;;  %v262_v59 = vsel %vm252_vm4, %v248_v51, 1326507024  ;;  %v333_v11 = vshrl.u32 %v332_v52, 5 }
  0xb1   : > { %v259_v61 = vsel %vm251_vm2, %v242_v49, %v258_v58  ;;  %v263_v62 = vsel %vm251_vm2, %v245_v50, %v262_v59  ;;  %v256_v0 = vsel %vm250_vm5, %v253_v53, %v255_v57  ;;  %v335_v12 = vsub.s32 32, %v334_v63 }
  0xb2   : > { %v260_v1 = vsel %vm250_vm5, %v257_v55, %v259_v61  ;;  %v264_v2 = vsel %vm250_vm5, %v261_v56, %v263_v62  ;;  %v272_v15 = vmul.u32 %v1000_v26, %v256_v0  ;;  %v337_v16 = vshll.u32 %v897_v28, %v334_v63 }
  0xb3   : > { %v1013_v4 = vmul.u32.u64.low %v1000_v26, %v264_v2  ;;  %v1014_v6 = vmul.u32.u64.high %v1000_v26, %v264_v2, %v1013_v4  ;;  %v1017_v7 = vmul.u32.u64.low %v1000_v26, %v260_v1  ;;  %v1018_v8 = vmul.u32.u64.high %v1000_v26, %v260_v1, %v1017_v7 }
  0xb4   : > { %v340_v17 = vshll.u32 %v898_v32, %v334_v63  ;;  %v343_v18 = vshll.u32 %v899_v34, %v334_v63  ;;  %v338_v19 = vshrl.u32 %v898_v32, %v335_v12  ;;  %v341_v20 = vshrl.u32 %v899_v34, %v335_v12 }
  0xb5   : > { %v344_v22 = vshrl.u32 %v900_v36, %v335_v12  ;;  %v346_v23 = vshll.u32 %v900_v36, %v334_v63  ;;  %vm274_vm6 = vc.u32 %v1014_v6, %v1017_v7  ;;  %v275_v24 = vadd.s32 1, %v1018_v8 }
  0xb6   : > { %v347_v25 = vshrl.u32 %v901_v38, %v335_v12  ;;  %v349_v27 = vshll.u32 %v901_v38, %v334_v63  ;;  %v339_v29 = vor.u32 %v338_v19, %v337_v16  ;;  %v342_v30 = vor.u32 %v341_v20, %v340_v17 }
  0xb7   : > { %v345_v31 = vor.u32 %v344_v22, %v343_v18  ;;  %v350_v33 = vshrl.u32 %v902_v45, %v335_v12  ;;  %v276_v26 = vsel %vm274_vm6, %v275_v24, %v1018_v8  ;;  %vm352_vm7 = vcmp.lt.s32.totalorder %v333_v11, 1 }
  0xb8   : > { %v348_v35 = vor.u32 %v347_v25, %v346_v23  ;;  %vm355_vm8 = vcmp.lt.s32.totalorder %v333_v11, 4  ;;  %v277_v32 = vadd.s32 %v276_v26, %v272_v15  ;;  %vm354_vm9 = vcmp.lt.s32.totalorder %v333_v11, 3 }
  0xb9   : > { %v351_v34 = vor.u32 %v350_v33, %v349_v27  ;;  %v357_v36 = vsel %vm355_vm8, %v345_v31, 2102212464  ;;  %v336_v37 = vshrl.u32 %v897_v28, %v335_v12  ;;  %v360_v39 = vsel %vm352_vm7, %v339_v29, %v342_v30 }
  0xba   : > { %v361_v40 = vsel %vm355_vm8, %v348_v35, 920167782  ;;  %v364_v41 = vsel %vm352_vm7, %v342_v30, %v345_v31  ;;  %v278_v42 = vadd.s32 536870912, %v277_v32  ;;  %vm353_vm10 = vcmp.lt.s32.totalorder %v333_v11, 2 }
  0xbb   : > { %v362_v38 = vsel %vm354_vm9, %v345_v31, %v361_v40  ;;  %v365_v43 = vsel %vm355_vm8, %v351_v34, 1326507024  ;;  %v356_v44 = vsel %vm352_vm7, %v336_v37, %v339_v29  ;;  %v358_v45 = vsel %vm354_vm9, %v342_v30, %v357_v36 }
  0xbc   : > { %v363_v46 = vsel %vm353_vm10, %v360_v39, %v362_v38  ;;  %v366_v47 = vsel %vm354_vm9, %v348_v35, %v365_v43  ;;  %v279_v48 = vshrl.u32 %v278_v42, 30  ;;  %v359_v54 = vsel %vm353_vm10, %v356_v44, %v358_v45 }
  0xbd   : > { %v367_v49 = vsel %vm353_vm10, %v364_v41, %v366_v47  ;;  %v1028_v50 = vmul.u32.u64.low %v368_v13, %v363_v46  ;;  %v1029_v51 = vmul.u32.u64.high %v368_v13, %v363_v46, %v1028_v50  ;;  %v375_v57 = vmul.u32 %v368_v13, %v359_v54 }
  0xbe   : > { %v1031_v52 = vmul.u32.u64.low %v368_v13, %v367_v49  ;;  %v1032_v53 = vmul.u32.u64.high %v368_v13, %v367_v49, %v1031_v52  ;;  %v280_v28 = vshll.u32 %v279_v48, 30  ;;  %v273_v11 = vadd.s32 %v1017_v7, %v1014_v6 }
  0xbf   : > { %v378_v56 = vadd.s32 1, %v1029_v51  ;;  %v303_v33 = vsub.s32 4, %v279_v48  ;;  %vm321_vm1 = vcmp.le.f32.partialorder %v320_v21, 0.7853982  ;;  %vm309_vm8 = vweird.f32 %v990_v9 }
  0xc0   : > { %v281_v55 = vsub.s32 %v277_v32, %v280_v28  ;;  %vm377_vm11 = vc.u32 %v1032_v53, %v1028_v50  ;;  %v376_v6 = vadd.s32 %v1028_v50, %v1032_v53 }
  0xc1   : > { %v379_v59 = vsel %vm377_vm11, %v378_v56, %v1029_v51  ;;  %v304_v39 = vsel %vm219_vm14, %v303_v33, %v279_v48 }
  0xc2   : > { %v283_v58 = vsub.s32 0, %v281_v55  ;;  %v380_v60 = vadd.s32 %v379_v59, %v375_v57  ;;  %v306_v43 = vsel %vm218_vm15, 0, %v304_v39 }
  0xc3   : > { %v516_v46 = vadd.s32 3, %v306_v43  ;;  %v310_v51 = vand.u32 3, %v306_v43 }
  0xc4   : > { %v744_v61 = vmin.u32 %v283_v58, %v281_v55  ;;  %v381_v62 = vadd.s32 536870912, %v380_v60 }
  0xc5   : > { %v517_v10 = vand.u32 3, %v516_v46  ;;  %vm315_vm2 = vcmp.eq.s32.totalorder %v310_v51, 2  ;;  %vm312_vm4 = vcmp.eq.s32.totalorder %v310_v51, 0  ;;  %vm311_vm6 = vcmp.lt.s32.totalorder %v310_v51, 2 }
  0xc6   : > { %v285_v63 = vclz %v744_v61  ;;  %v382_v0 = vshrl.u32 %v381_v62, 30 }
  0xc7   : > { %vm522_vm3 = vcmp.eq.s32.totalorder %v517_v10, 2  ;;  %vm519_vm5 = vcmp.eq.s32.totalorder %v517_v10, 0  ;;  %vm518_vm7 = vcmp.lt.s32.totalorder %v517_v10, 2 }
  0xc8   : > { %v745_v1 = vadd.s32 4294967294, %v285_v63  ;;  %v383_v2 = vshll.u32 %v382_v0, 30  ;;  %v406_v49 = vsub.s32 4, %v382_v0 }
  0xca   : > { %vm746_vm12 = vcmp.lt.s32.totalorder %v745_v1, 0  ;;  %v384_v8 = vsub.s32 %v380_v60, %v383_v2  ;;  %v407_v52 = vsel %vm322_vm0, %v406_v49, %v382_v0  ;;  %v636_v60 = vpop.permute.xlu1 %635 }
  0xcb   : > { %v288_v4 = vsel %vm746_vm12, 0, %v745_v1  ;;  %v409_v57 = vsel %vm321_vm1, 0, %v407_v52 }
  0xcc   : > { %v289_v12 = vsub.s32 32, %v288_v4  ;;  %v293_v13 = vsub.s32 4294967266, %v288_v4  ;;  %v386_v15 = vsub.s32 0, %v384_v8  ;;  %v290_v16 = vshll.u32 %v281_v55, %v288_v4 }
  0xcd   : > { %v620_v0 = vadd.s32 3, %v409_v57 }
  0xce   : > { %v291_v17 = vshrl.u32 %v273_v11, %v289_v12  ;;  %v294_v18 = vadd.s32 127, %v293_v13  ;;  %v748_v19 = vmin.u32 %v386_v15, %v384_v8  ;;  %v413_v12 = vand.u32 3, %v409_v57 }
  0xcf   : > { %v621_v13 = vand.u32 3, %v620_v0 }
  0xd0   : > { %v292_v20 = vor.u32 %v291_v17, %v290_v16  ;;  %v295_v22 = vshll.u32 %v294_v18, 23  ;;  %v388_v23 = vclz %v748_v19  ;;  %vm418_vm9 = vcmp.eq.s32.totalorder %v413_v12, 2 }
  0xd1   : > { %vm626_vm10 = vcmp.eq.s32.totalorder %v621_v13, 2  ;;  %vm415_vm11 = vcmp.eq.s32.totalorder %v413_v12, 0  ;;  %vm623_vm12 = vcmp.eq.s32.totalorder %v621_v13, 0 }
  0xd2   : > { %v296_v24 = vor.u32 4788187, %v295_v22  ;;  %v749_v25 = vadd.s32 4294967294, %v388_v23  ;;  %v299_v29 = vcvt.s32.f32 %v292_v20  ;;  %v638_v20 = vpop.permute.xlu1 %637 }
  0xd4   : > { %v297_v27 = vand.u32 2147483647, %v296_v24  ;;  %vm750_vm13 = vcmp.lt.s32.totalorder %v749_v25, 0 }
  0xd5   : > { %v391_v31 = vsel %vm750_vm13, 0, %v749_v25  ;;  %vm414_vm13 = vcmp.lt.s32.totalorder %v413_v12, 2 }
  0xd6   : > { %v300_v30 = vmul.f32 %v299_v29, %v297_v27  ;;  %v392_v7 = vsub.s32 32, %v391_v31  ;;  %v396_v26 = vsub.s32 4294967266, %v391_v31  ;;  %v393_v32 = vshll.u32 %v384_v8, %v391_v31 }
  0xd8   : > { %v301_v35 = vxor.u32 2147483648, %v300_v30  ;;  %v394_v34 = vshrl.u32 %v376_v6, %v392_v7  ;;  %v397_v36 = vadd.s32 127, %v396_v26 }
  0xda   : > { %v302_v37 = vsel %vm219_vm14, %v301_v35, %v300_v30  ;;  %v395_v40 = vor.u32 %v394_v34, %v393_v32  ;;  %v398_v41 = vshll.u32 %v397_v36, 23  ;;  %vm622_vm14 = vcmp.lt.s32.totalorder %v621_v13, 2 }
  0xdb   : > { %v305_v42 = vsel %vm218_vm15, %v990_v9, %v302_v37  ;;  %vm412_vm15 = vweird.f32 %v994_v14 }
  0xdc   : > { %823 = vcosq.f32 %v305_v42  ;;  %v399_v38 = vor.u32 4788187, %v398_v41  ;;  %v402_v45 = vcvt.s32.f32 %v395_v40 }
  0xdd   : > { %825 = vsinq.f32 %v305_v42 }
  0xde   : > { %v400_v44 = vand.u32 2147483647, %v399_v38 }
  0xe0   : > { %v403_v47 = vmul.f32 %v402_v45, %v400_v44 }
  0xe2   : > { %v404_v50 = vxor.u32 2147483648, %v403_v47 }
  0xe4   : > { %v405_v48 = vsel %vm322_vm0, %v404_v50, %v403_v47 }
  0xe5   : > { %v408_v28 = vsel %vm321_vm1, %v994_v14, %v405_v48 }
  0xe6   : > { %v824_v53 = vpop.eup %823  ;;  %827 = vcosq.f32 %v408_v28 }
  0xe7   : > { %v826_v54 = vpop.eup %825  ;;  %v316_v55 = vxor.u32 2147483648, %v824_v53  ;;  %829 = vsinq.f32 %v408_v28 }
  0xe8   : > { %v313_v56 = vxor.u32 2147483648, %v826_v54 }
  0xe9   : > { %v317_v58 = vsel %vm315_vm2, %v316_v55, %v826_v54  ;;  %v524_v59 = vsel %vm522_vm3, %v316_v55, %v826_v54 }
  0xea   : > { %v314_v21 = vsel %vm312_vm4, %v824_v53, %v313_v56  ;;  %v521_v61 = vsel %vm519_vm5, %v824_v53, %v313_v56 }
  0xeb   : > { %v318_v62 = vsel %vm311_vm6, %v314_v21, %v317_v58  ;;  %v525_v63 = vsel %vm518_vm7, %v521_v61, %v524_v59 }
  0xec   : > { %v319_v1 = vsel %vm309_vm8, nan, %v318_v62  ;;  %v526_v2 = vsel %vm309_vm8, nan, %v525_v63 }
  0xed   : > { %v633_v4 = vmul.f32 %v981_v3, %v319_v1  ;;  %v639_v8 = vmul.f32 %v636_v60, %v526_v2 }
  0xef   : > { %v641_v11 = vadd.f32 %v639_v8, %v633_v4 }
  0xf0   : > { %v828_v15 = vpop.eup %827 }
  0xf1   : > { %643 = vst [vmem:[%s180_s10] sm:$0xff] %v641_v11  ;;  %v830_v16 = vpop.eup %829  ;;  %v419_v17 = vxor.u32 2147483648, %v828_v15 }
  0xf2   : > { %v416_v18 = vxor.u32 2147483648, %v830_v16 }
  0xf3   : > { %v420_v9 = vsel %vm418_vm9, %v419_v17, %v830_v16  ;;  %v628_v19 = vsel %vm626_vm10, %v419_v17, %v830_v16 }
  0xf4   : > { %v417_v3 = vsel %vm415_vm11, %v828_v15, %v416_v18  ;;  %v625_v22 = vsel %vm623_vm12, %v828_v15, %v416_v18 }
  0xf5   : > { %v421_v23 = vsel %vm414_vm13, %v417_v3, %v420_v9  ;;  %v629_v24 = vsel %vm622_vm14, %v625_v22, %v628_v19 }
  0xf6   : > { %v422_v25 = vsel %vm412_vm15, nan, %v421_v23  ;;  %v630_v27 = vsel %vm412_vm15, nan, %v629_v24 }
  0xf7   : > { %v634_v29 = vmul.f32 %v984_v5, %v422_v25  ;;  %v640_v30 = vmul.f32 %v638_v20, %v630_v27 }
  0xf9   : > { %v642_v31 = vadd.f32 %v640_v30, %v634_v29 }
  0xfb   : > { %644 = vst [vmem:[%s180_s10 + $0x8] sm:$0xff] %v642_v31 }
  0xfc   : > { %844 = shalt.err (!%p841_p3)
}
  0xfd   : > { %s845_s29 = scalar_lea.hbm %s1061_s24, 256  ;;  %s849_s5 = scalar_lea.hbm %s1109_s3, 1024 }
  0xfe   : > { %p846_p4 = scmp.ne.s32.totalorder %s1061_s24, %s845_s29  ;;  %p850_p9 = scmp.lt.u32.totalorder %s1061_s24, %s1109_s3 }
  0xff   : > { %p851_p10 = scmp.lt.u32.totalorder %s849_s5, %s845_s29  ;;  %p853_p12 = scmp.lt.u32.totalorder %s845_s29, %s1061_s24 }
 0x100   : > { %p847_p7 = pnand %p846_p4, %p964_p5 }
 0x101   : > { %p852_p11 = por %p851_p10, %p850_p9 }
 0x102   : > { %p848_p8 = pneg %p847_p7 }
 0x103   : > { %p854_p13 = por %p853_p12, %p852_p11 }
 0x105   : > { %p855_p0 = pnand %p854_p13, %p848_p8 }
 0x107   : > { %858 = shalt.err (!%p855_p0)
}
 0x108   : > { %s904_s8 = smov 128   ;;  %s905_s9 = smov 8  }
 0x109   : > { %773 = dma.vmem_to_hbm [thread:$0]  (%p964_p5), %s1056_s11, 256, %s1061_s24, %s1065_s25, %s904_s8, %s904_s8, %s905_s9  }
 0x10a PF: > { %p779_p1 = scmp.ge.s32.totalorder %s893_s15, 2  ;;  %s674_s10 = sand.u32 1, %s881_s12  }
 0x10b   : > { %s675_s17 = scalar_lea.sflag [#allocation3], %s674_s10 }
 0x10c   : > { %p776_p2 = pnand %p779_p1, %p968_p6 }
 0x10e   : > { %876 = dma.done.wait (!%p776_p2), %s675_s17, 256  }
 0x10f   : > { %878 = vsyncadd (!%p776_p2), %s675_s17, 4294967040  ;;  %p13_p3 = scmp.ge.s32.totalorder %s951_s18, 6   ;;  %s1112_s12 = smov %s885_s13 }
 0x110   : > { %s1113_s13 = smov %s889_s14  ;;  %s1114_s14 = smov %s962_s21 }
 0x111   : > { %s1115_s15 = smov %s951_s18  ;;  %15 = sbr.rel (!%p13_p3) target bundleno = 3 (0x3), region = 70 }
 0x118   :  { %680 = vsyncpa [#allocation3], 1 }
 0x119   :  { %682 = vsyncpa [#allocation3 + $0x1], 1 }

</bundles_post_ra>
